<compile_context>
chip_gen: v5e
topology: v5e:2x2
jax: 0.10.0
libtpu: 0.0.40
codegen_flags: <defaults>
</compile_context>

<pallas_src>
import functools

import jax
import jax.numpy as jnp
from jax.experimental import pallas as pl
from jax.experimental.pallas import tpu as pltpu


def _make_kernel(K, Cout, Cin, Wpp, M1):
    """Direct conv + fused BN shift + ReLU over one (padded, flattened) image."""

    def kernel(w_ref, x_ref, b_ref, o_ref):
        # w_ref: (K*K, Cout, Cin) bf16   conv weight, BN scale pre-folded (resident)
        # x_ref: (1, Cin, Hp2*Wpp) bf16  zero-padded image, H*W flattened (per n)
        # b_ref: (Cout, 1) f32           fused BN shift = beta - mean * scale
        # o_ref: (1, Cout, M1) f32       stride-1 output rows with pitch Wpp
        ximg = x_ref[0]                                    # (Cin, Hp2*Wpp) bf16
        # Fold the BN shift in by initializing the f32 accumulator with it.
        acc = jnp.broadcast_to(b_ref[...], (Cout, M1))     # f32
        for dy in range(K):
            for dx in range(K):
                off = dy * Wpp + dx                        # static tap offset
                xs = ximg[:, off:off + M1]                 # (Cin, M1) bf16
                acc = acc + jnp.dot(w_ref[dy * K + dx], xs,
                                    preferred_element_type=jnp.float32)
        o_ref[0] = jnp.maximum(acc, 0.0).astype(o_ref.dtype)

    return kernel


@functools.partial(jax.jit, static_argnames=("kernel_size", "padding", "stride"))
def conv2d_relu(x_nchw, weight, gamma, beta, running_mean, running_var,
                kernel_size, padding, stride=1, eps=1e-5):
    N, Cin, H, W = x_nchw.shape
    Cout = weight.shape[0]
    K, P, S = kernel_size, padding, stride

    # Dense (stride-1) output dims; the stride-S output is a subsample of it.
    H1 = H + 2 * P - K + 1
    W1 = W + 2 * P - K + 1
    Hout = (H + 2 * P - K) // S + 1
    Wout = (W + 2 * P - K) // S + 1

    Wpp = W + 2 * P          # shared row pitch of padded input and dense output
    Hp2 = H + 2 * P + 1      # +1 zero row so every shifted flat window stays in-bounds
    M1 = H1 * Wpp            # flattened dense-output length (incl. K-1 pad cols/row)

    # ---- fold eval-mode BatchNorm: scale into the weight, keep the shift ----
    scale = gamma / jnp.sqrt(running_var + eps)
    shift = (beta - running_mean * scale).astype(jnp.float32).reshape(Cout, 1)
    w_folded = weight * scale[:, None, None, None]                  # f32 fold
    # Tap-major layout: w_taps[dy*K + dx] == w_folded[:, :, dy, dx]  (Cout, Cin)
    w_taps = jnp.transpose(w_folded, (2, 3, 0, 1)).reshape(K * K, Cout, Cin)
    w_taps = w_taps.astype(jnp.bfloat16)

    # ---- zero-pad spatially and flatten H*W (free reshape; no im2col) ----
    xp = jnp.pad(x_nchw.astype(jnp.bfloat16),
                 ((0, 0), (0, 0), (P, P + 1), (P, P)))              # (N,Cin,Hp2,Wpp)
    x_flat = xp.reshape(N, Cin, Hp2 * Wpp)

    kernel = _make_kernel(K, Cout, Cin, Wpp, M1)

    out_flat = pl.pallas_call(
        kernel,
        out_shape=jax.ShapeDtypeStruct((N, Cout, M1), jnp.float32),
        grid_spec=pltpu.PrefetchScalarGridSpec(
            num_scalar_prefetch=0,
            grid=(N,),
            in_specs=[
                pl.BlockSpec((K * K, Cout, Cin), lambda n: (0, 0, 0)),   # taps (resident)
                pl.BlockSpec((1, Cin, Hp2 * Wpp), lambda n: (n, 0, 0)),  # one image
                pl.BlockSpec((Cout, 1), lambda n: (0, 0)),               # BN shift
            ],
            out_specs=pl.BlockSpec((1, Cout, M1), lambda n: (n, 0, 0)),
        ),
        compiler_params=pltpu.CompilerParams(
            dimension_semantics=("parallel",),
            vmem_limit_bytes=32 * 1024 * 1024),
    )(w_taps, x_flat, shift)

    # Drop the K-1 pitch-padding columns per row (and subsample for stride > 1).
    out = out_flat.reshape(N, Cout, H1, Wpp)
    out = out[:, :, ::S, ::S][:, :, :Hout, :Wout]
    return out


if __name__ == "__main__":
    # Module config: Conv2dReLU(in_channels=4, out_channels=8, kernel_size=3,
    #                           padding=1, stride=1, use_batchnorm=True)
    N, Cin, H, W = 2, 4, 16, 16
    Cout, K, P, S = 8, 3, 1, 1

    key = jax.random.PRNGKey(0)
    kx, kw, kg, kb, km, kv = jax.random.split(key, 6)

    x = jax.random.normal(kx, (N, Cin, H, W), dtype=jnp.float32)
    weight = jax.random.normal(kw, (Cout, Cin, K, K), dtype=jnp.float32) * 0.1
    gamma = 1.0 + 0.1 * jax.random.normal(kg, (Cout,), dtype=jnp.float32)
    beta = 0.1 * jax.random.normal(kb, (Cout,), dtype=jnp.float32)
    running_mean = 0.1 * jax.random.normal(km, (Cout,), dtype=jnp.float32)
    running_var = jnp.abs(jax.random.normal(kv, (Cout,), dtype=jnp.float32)) + 0.5

    out = conv2d_relu(x, weight, gamma, beta, running_mean, running_var,
                      kernel_size=K, padding=P, stride=S)
    out = jax.block_until_ready(out)
    assert out.shape == (N, Cout, H, W)

    eps = 1e-5
    scale = gamma / jnp.sqrt(running_var + eps)
    shift = beta - running_mean * scale

    # Matched-precision reference: same bf16 operand rounding as the kernel,
    # f32 accumulation -> tight tolerance.
    x_bf = x.astype(jnp.bfloat16).astype(jnp.float32)
    w_folded_bf = (weight * scale[:, None, None, None]
                   ).astype(jnp.bfloat16).astype(jnp.float32)
    ref = jax.lax.conv_general_dilated(
        x_bf, w_folded_bf, window_strides=(S, S), padding=[(P, P), (P, P)],
        dimension_numbers=("NCHW", "OIHW", "NCHW"),
        precision=jax.lax.Precision.HIGHEST)
    ref = jnp.maximum(ref + shift[None, :, None, None], 0.0)
    assert jnp.allclose(out, ref, atol=1e-3, rtol=1e-3)

    # Loose sanity check vs the pure-f32 (PyTorch-exact) reference; bf16
    # operand rounding bounds the deviation.
    ref32 = jax.lax.conv_general_dilated(
        x, weight, window_strides=(S, S), padding=[(P, P), (P, P)],
        dimension_numbers=("NCHW", "OIHW", "NCHW"),
        precision=jax.lax.Precision.HIGHEST)
    ref32 = jnp.maximum(ref32 * scale[None, :, None, None]
                        + shift[None, :, None, None], 0.0)
    assert float(jnp.max(jnp.abs(out - ref32))) < 1e-1

    print("KERNEL_OK")
</pallas_src>

<mosaic_0001>
module attributes {stable_mosaic.version = 11 : i64} {
  func.func @kernel(%arg0: i32, %arg1: memref<9x8x4xbf16, #tpu.memory_space<vmem>>, %arg2: memref<1x4x342xbf16, #tpu.memory_space<vmem>>, %arg3: memref<8x1xf32, #tpu.memory_space<vmem>>, %arg4: memref<1x8x288xf32, #tpu.memory_space<vmem>>) attributes {dimension_semantics = [#tpu.dimension_semantics<parallel>], iteration_bounds = array<i64: 2>, scalar_prefetch = 0 : i64, scratch_operands = 0 : i64, tpu.core_type = #tpu.core_type<tc>, window_params = [{pipeline_mode = #tpu.pipeline_mode<synchronous>, transform_indices = @transform_0, window_bounds = array<i64: 9, 8, 4>}, {transform_indices = @transform_1, window_bounds = array<i64: 1, 4, 342>}, {pipeline_mode = #tpu.pipeline_mode<synchronous>, transform_indices = @transform_2, window_bounds = array<i64: 8, 1>}, {transform_indices = @transform_3, window_bounds = array<i64: 1, 8, 288>}]} {
    %c0 = arith.constant 0 : index
    %c0_0 = arith.constant 0 : index
    %c0_1 = arith.constant 0 : index
    %0 = vector.load %arg2[%c0, %c0_0, %c0_1] : memref<1x4x342xbf16, #tpu.memory_space<vmem>>, vector<1x4x342xbf16>
    %1 = vector.shape_cast %0 : vector<1x4x342xbf16> to vector<4x342xbf16>
    %c0_2 = arith.constant 0 : index
    %c0_3 = arith.constant 0 : index
    %2 = vector.load %arg3[%c0_2, %c0_3] : memref<8x1xf32, #tpu.memory_space<vmem>>, vector<8x1xf32>
    %3 = vector.shape_cast %2 : vector<8x1xf32> to vector<8x1xf32>
    %4 = vector.broadcast %3 : vector<8x1xf32> to vector<8x288xf32>
    %5 = vector.extract_strided_slice %1 {offsets = [0, 0], sizes = [4, 288], strides = [1, 1]} : vector<4x342xbf16> to vector<4x288xbf16>
    %c0_4 = arith.constant 0 : index
    %c0_5 = arith.constant 0 : index
    %c0_6 = arith.constant 0 : index
    %6 = vector.load %arg1[%c0_4, %c0_5, %c0_6] : memref<9x8x4xbf16, #tpu.memory_space<vmem>>, vector<1x8x4xbf16>
    %7 = vector.shape_cast %6 : vector<1x8x4xbf16> to vector<8x4xbf16>
    %cst = arith.constant dense<0.000000e+00> : vector<8x288xf32>
    %8 = tpu.matmul %7, %5, %cst {dimension_numbers = #tpu.dot_dimension_numbers<[1], [0], [0], [1], [0, 0, 1, 1], [], []>} : vector<8x4xbf16>, vector<4x288xbf16>, vector<8x288xf32> -> vector<8x288xf32>
    %9 = arith.addf %4, %8 : vector<8x288xf32>
    %10 = vector.extract_strided_slice %1 {offsets = [0, 1], sizes = [4, 288], strides = [1, 1]} : vector<4x342xbf16> to vector<4x288xbf16>
    %c1 = arith.constant 1 : index
    %c0_7 = arith.constant 0 : index
    %c0_8 = arith.constant 0 : index
    %11 = vector.load %arg1[%c1, %c0_7, %c0_8] : memref<9x8x4xbf16, #tpu.memory_space<vmem>>, vector<1x8x4xbf16>
    %12 = vector.shape_cast %11 : vector<1x8x4xbf16> to vector<8x4xbf16>
    %cst_9 = arith.constant dense<0.000000e+00> : vector<8x288xf32>
    %13 = tpu.matmul %12, %10, %cst_9 {dimension_numbers = #tpu.dot_dimension_numbers<[1], [0], [0], [1], [0, 0, 1, 1], [], []>} : vector<8x4xbf16>, vector<4x288xbf16>, vector<8x288xf32> -> vector<8x288xf32>
    %14 = arith.addf %9, %13 : vector<8x288xf32>
    %15 = vector.extract_strided_slice %1 {offsets = [0, 2], sizes = [4, 288], strides = [1, 1]} : vector<4x342xbf16> to vector<4x288xbf16>
    %c2 = arith.constant 2 : index
    %c0_10 = arith.constant 0 : index
    %c0_11 = arith.constant 0 : index
    %16 = vector.load %arg1[%c2, %c0_10, %c0_11] : memref<9x8x4xbf16, #tpu.memory_space<vmem>>, vector<1x8x4xbf16>
    %17 = vector.shape_cast %16 : vector<1x8x4xbf16> to vector<8x4xbf16>
    %cst_12 = arith.constant dense<0.000000e+00> : vector<8x288xf32>
    %18 = tpu.matmul %17, %15, %cst_12 {dimension_numbers = #tpu.dot_dimension_numbers<[1], [0], [0], [1], [0, 0, 1, 1], [], []>} : vector<8x4xbf16>, vector<4x288xbf16>, vector<8x288xf32> -> vector<8x288xf32>
    %19 = arith.addf %14, %18 : vector<8x288xf32>
    %20 = vector.extract_strided_slice %1 {offsets = [0, 18], sizes = [4, 288], strides = [1, 1]} : vector<4x342xbf16> to vector<4x288xbf16>
    %c3 = arith.constant 3 : index
    %c0_13 = arith.constant 0 : index
    %c0_14 = arith.constant 0 : index
    %21 = vector.load %arg1[%c3, %c0_13, %c0_14] : memref<9x8x4xbf16, #tpu.memory_space<vmem>>, vector<1x8x4xbf16>
    %22 = vector.shape_cast %21 : vector<1x8x4xbf16> to vector<8x4xbf16>
    %cst_15 = arith.constant dense<0.000000e+00> : vector<8x288xf32>
    %23 = tpu.matmul %22, %20, %cst_15 {dimension_numbers = #tpu.dot_dimension_numbers<[1], [0], [0], [1], [0, 0, 1, 1], [], []>} : vector<8x4xbf16>, vector<4x288xbf16>, vector<8x288xf32> -> vector<8x288xf32>
    %24 = arith.addf %19, %23 : vector<8x288xf32>
    %25 = vector.extract_strided_slice %1 {offsets = [0, 19], sizes = [4, 288], strides = [1, 1]} : vector<4x342xbf16> to vector<4x288xbf16>
    %c4 = arith.constant 4 : index
    %c0_16 = arith.constant 0 : index
    %c0_17 = arith.constant 0 : index
    %26 = vector.load %arg1[%c4, %c0_16, %c0_17] : memref<9x8x4xbf16, #tpu.memory_space<vmem>>, vector<1x8x4xbf16>
    %27 = vector.shape_cast %26 : vector<1x8x4xbf16> to vector<8x4xbf16>
    %cst_18 = arith.constant dense<0.000000e+00> : vector<8x288xf32>
    %28 = tpu.matmul %27, %25, %cst_18 {dimension_numbers = #tpu.dot_dimension_numbers<[1], [0], [0], [1], [0, 0, 1, 1], [], []>} : vector<8x4xbf16>, vector<4x288xbf16>, vector<8x288xf32> -> vector<8x288xf32>
    %29 = arith.addf %24, %28 : vector<8x288xf32>
    %30 = vector.extract_strided_slice %1 {offsets = [0, 20], sizes = [4, 288], strides = [1, 1]} : vector<4x342xbf16> to vector<4x288xbf16>
    %c5 = arith.constant 5 : index
    %c0_19 = arith.constant 0 : index
    %c0_20 = arith.constant 0 : index
    %31 = vector.load %arg1[%c5, %c0_19, %c0_20] : memref<9x8x4xbf16, #tpu.memory_space<vmem>>, vector<1x8x4xbf16>
    %32 = vector.shape_cast %31 : vector<1x8x4xbf16> to vector<8x4xbf16>
    %cst_21 = arith.constant dense<0.000000e+00> : vector<8x288xf32>
    %33 = tpu.matmul %32, %30, %cst_21 {dimension_numbers = #tpu.dot_dimension_numbers<[1], [0], [0], [1], [0, 0, 1, 1], [], []>} : vector<8x4xbf16>, vector<4x288xbf16>, vector<8x288xf32> -> vector<8x288xf32>
    %34 = arith.addf %29, %33 : vector<8x288xf32>
    %35 = vector.extract_strided_slice %1 {offsets = [0, 36], sizes = [4, 288], strides = [1, 1]} : vector<4x342xbf16> to vector<4x288xbf16>
    %c6 = arith.constant 6 : index
    %c0_22 = arith.constant 0 : index
    %c0_23 = arith.constant 0 : index
    %36 = vector.load %arg1[%c6, %c0_22, %c0_23] : memref<9x8x4xbf16, #tpu.memory_space<vmem>>, vector<1x8x4xbf16>
    %37 = vector.shape_cast %36 : vector<1x8x4xbf16> to vector<8x4xbf16>
    %cst_24 = arith.constant dense<0.000000e+00> : vector<8x288xf32>
    %38 = tpu.matmul %37, %35, %cst_24 {dimension_numbers = #tpu.dot_dimension_numbers<[1], [0], [0], [1], [0, 0, 1, 1], [], []>} : vector<8x4xbf16>, vector<4x288xbf16>, vector<8x288xf32> -> vector<8x288xf32>
    %39 = arith.addf %34, %38 : vector<8x288xf32>
    %40 = vector.extract_strided_slice %1 {offsets = [0, 37], sizes = [4, 288], strides = [1, 1]} : vector<4x342xbf16> to vector<4x288xbf16>
    %c7 = arith.constant 7 : index
    %c0_25 = arith.constant 0 : index
    %c0_26 = arith.constant 0 : index
    %41 = vector.load %arg1[%c7, %c0_25, %c0_26] : memref<9x8x4xbf16, #tpu.memory_space<vmem>>, vector<1x8x4xbf16>
    %42 = vector.shape_cast %41 : vector<1x8x4xbf16> to vector<8x4xbf16>
    %cst_27 = arith.constant dense<0.000000e+00> : vector<8x288xf32>
    %43 = tpu.matmul %42, %40, %cst_27 {dimension_numbers = #tpu.dot_dimension_numbers<[1], [0], [0], [1], [0, 0, 1, 1], [], []>} : vector<8x4xbf16>, vector<4x288xbf16>, vector<8x288xf32> -> vector<8x288xf32>
    %44 = arith.addf %39, %43 : vector<8x288xf32>
    %45 = vector.extract_strided_slice %1 {offsets = [0, 38], sizes = [4, 288], strides = [1, 1]} : vector<4x342xbf16> to vector<4x288xbf16>
    %c8 = arith.constant 8 : index
    %c0_28 = arith.constant 0 : index
    %c0_29 = arith.constant 0 : index
    %46 = vector.load %arg1[%c8, %c0_28, %c0_29] : memref<9x8x4xbf16, #tpu.memory_space<vmem>>, vector<1x8x4xbf16>
    %47 = vector.shape_cast %46 : vector<1x8x4xbf16> to vector<8x4xbf16>
    %cst_30 = arith.constant dense<0.000000e+00> : vector<8x288xf32>
    %48 = tpu.matmul %47, %45, %cst_30 {dimension_numbers = #tpu.dot_dimension_numbers<[1], [0], [0], [1], [0, 0, 1, 1], [], []>} : vector<8x4xbf16>, vector<4x288xbf16>, vector<8x288xf32> -> vector<8x288xf32>
    %49 = arith.addf %44, %48 : vector<8x288xf32>
    %cst_31 = arith.constant 0.000000e+00 : f32
    %50 = vector.broadcast %cst_31 : f32 to vector<8x288xf32>
    %51 = arith.maximumf %49, %50 : vector<8x288xf32>
    %c0_32 = arith.constant 0 : index
    %c0_33 = arith.constant 0 : index
    %c0_34 = arith.constant 0 : index
    %52 = vector.load %arg4[%c0_32, %c0_33, %c0_34] : memref<1x8x288xf32, #tpu.memory_space<vmem>>, vector<1x8x288xf32>
    %53 = vector.shape_cast %52 : vector<1x8x288xf32> to vector<8x288xf32>
    %54 = vector.shape_cast %51 : vector<8x288xf32> to vector<1x8x288xf32>
    tpu.vector_store %arg4[%c0_32, %c0_33, %c0_34], %54 {strides = array<i32>} : memref<1x8x288xf32, #tpu.memory_space<vmem>>, vector<1x8x288xf32>,
    return
  }
  func.func @transform_0(%arg0: i32) -> (i32, i32, i32) {
    %c0_i32 = arith.constant 0 : i32
    %c0_i32_0 = arith.constant 0 : i32
    %c0_i32_1 = arith.constant 0 : i32
    %c0_i32_2 = arith.constant 0 : i32
    return %c0_i32, %c0_i32_0, %c0_i32_1 : i32, i32, i32
  }
  func.func @transform_1(%arg0: i32) -> (i32, i32, i32) {
    %c0_i32 = arith.constant 0 : i32
    %c0_i32_0 = arith.constant 0 : i32
    %c0_i32_1 = arith.constant 0 : i32
    return %arg0, %c0_i32, %c0_i32_0 : i32, i32, i32
  }
  func.func @transform_2(%arg0: i32) -> (i32, i32) {
    %c0_i32 = arith.constant 0 : i32
    %c0_i32_0 = arith.constant 0 : i32
    %c0_i32_1 = arith.constant 0 : i32
    return %c0_i32, %c0_i32_0 : i32, i32
  }
  func.func @transform_3(%arg0: i32) -> (i32, i32, i32) {
    %c0_i32 = arith.constant 0 : i32
    %c0_i32_0 = arith.constant 0 : i32
    %c0_i32_1 = arith.constant 0 : i32
    return %arg0, %c0_i32, %c0_i32_0 : i32, i32, i32
  }
}

</mosaic_0001>

<bundles_post_ra>
// kernel: conv2d_relu.1
= control target key start
LH: loop header
LB: loop body
LE: loop exit
PB: predicated region body
PF: predicated region fallthrough
CT: control target
= control target key end

     0   :  { %s977_s12 = smov 0   ;;  %s1102_s0 = inlined_call_operand.vmem [shape: bf16[9,8,4], index: 0, kind: input, shape index: {}]   ;;  %s1103_s1 = inlined_call_operand.vmem [shape: bf16[2,4,342], index: 1, kind: input, shape index: {}]   ;;  %s1104_s2 = inlined_call_operand.vmem [shape: f32[8,1], index: 2, kind: input, shape index: {}]   ;;  %s1105_s3 = inlined_call_operand.vmem [shape: f32[2,8,288], index: 3, kind: output, shape index: {}]  }
   0x1 LB: > { %s876_s13 = sadd.s32 4294967295, %s946_s12   ;;  %p880_p0 = scmp.ge.s32.totalorder %s946_s12, 1  ;;  %s946_s12 = sphi %s977_s12, %s13_s12  }
   0x2   : > { %p137_p1 = scmp.lt.s32.totalorder %s946_s12, 3 }
   0x4   : > { %p138_p2 = pnand %p880_p0, %p137_p1 }
   0x5   : > { %p161_p3 = scmp.lt.s32.totalorder (!%p138_p2), %s876_s13, 1  ;;  %s948_s18 = smov (!%p138_p2), 127  }
   0x6   : > { %141 = sbr.rel (%p138_p2) target bundleno = 390 (0x186), region = 32  ;;  %s949_s19 = smov (!%p138_p2), 126  }
   0x7   : > { %s950_s20 = smov (!%p138_p2), 110   ;;  %s951_s21 = smov (!%p138_p2), 109  }
   0x8   : > { %s952_s24 = smov (!%p138_p2), 108   ;;  %s953_s25 = smov (!%p138_p2), 92  }
   0x9   : > { %s954_s26 = smov (!%p138_p2), 91   ;;  %s955_s27 = smov (!%p138_p2), 90  }
   0xb   : > { %s1107_s13 = smov (!%p161_p3, %s876_s13), 1  ;;  %vm189_vm0 = vcmask 1041408   ;;  %v179_v19 = vld [vmem:[%s1102_s0] sm:$0xf]  ;;  %vm185_vm1 = vcmask 31744   ;;  %v956_v35 = vmov 0  }
   0xc   : > { %s920_s14 = smul.u32 6, %s1107_s13  ;;  %v886_v34 = vld [vmem:[%s1102_s0 + $0x4] sm:$0xf]  ;;  %939 = vset.pattern.permute.xlu0 %v956_v35  ;;  %vm253_vm2 = vcmask 1039360   ;;  %vm325_vm3 = vcmask 1031168   ;;  %vm397_vm4 = vcmask 900096  }
   0xd   : > { %v173_v36 = vld [vmem:[%s1104_s2] sm:$0xff]  ;;  %v890_v54 = vld [vmem:[%s1102_s0 + $0x8] sm:$0xf]  ;;  %v894_v56 = vld [vmem:[%s1102_s0 + $0xc] sm:$0xf]  ;;  %vm469_vm5 = vcmask 891904  }
   0xe   : > { %s165_s17 = scalar_lea.vmem %s1103_s1, %s920_s14  ;;  %vm541_vm6 = vcmask 883712   ;;  %vm613_vm7 = vcmask 752640   ;;  %vm685_vm8 = vcmask 744448   ;;  %vm757_vm9 = vcmask 736256  }
   0xf   : > { %v991_v0 = vld [vmem:[%s165_s17] sm:$0x3f]  ;;  %vm819_vm10 = vcmask 261120  }
  0x10   : > { %181 = vst [vmem:[#allocation1] ss:$4 sm:$0xff] %v991_v0 }
  0x17   : > { %v182_v1 = vld.sshfl [vmem:[#allocation1] sm:$0xff pattern:$0x73625140]  ;;  %v183_v2 = vld.sshfl [vmem:[#allocation1 + $0x8] sm:$0xff pattern:$0x73625140] }
  0x18   : > { %v994_v3 = vld.sshfl [vmem:[#allocation1 + $0x10] sm:$0xff pattern:$0x73625140]  ;;  %v190_v16 = vsel %vm189_vm0, %v182_v1, 0  ;;  %v192_v17 = vsel %vm189_vm0, %v183_v2, 0 }
  0x19   : > { %240 = vst [vmem:[#allocation1] ss:$4 sm:$0xff] %v991_v0  ;;  %203 = vmatpush.bf16.msra.mxu0 %v190_v16  ;;  %216 = vmatpush.bf16.msra.mxu1 %v192_v17  ;;  %v194_v31 = vsel %vm189_vm0, %v994_v3, 0 }
  0x1a   : > { %229 = vmatpush.bf16.msra.mxu2 %v194_v31 }
  0x1c   : > { %884 = vmatmul.msk.bf16.vlgmr.msra.gmra.mxu1 %vm185_vm1, %v179_v19  ;;  %883 = vmatmul.msk.bf16.vlgmr.msra.gmra.mxu0 %vm185_vm1, %v179_v19 }
  0x1d   : > { %885 = vmatmul.msk.bf16.vlgmr.msra.gmra.mxu2 %vm185_vm1, %v179_v19 }
  0x20   : > { %v241_v4 = vld.sshfl [vmem:[#allocation1] sm:$0xff pattern:$0x73625140]  ;;  %v243_v5 = vld.sshfl [vmem:[#allocation1 + $0x8] sm:$0xff pattern:$0x73625140] }
  0x21   : > { %247 = vrot.lane.b32.xlu0 %v241_v4, %s948_s18  ;;  %v245_v6 = vld.sshfl [vmem:[#allocation1 + $0x10] sm:$0xff pattern:$0x73625140] }
  0x22   : > { %312 = vst [vmem:[#allocation1] ss:$4 sm:$0xff] %v991_v0  ;;  %251 = vrot.lane.b32.xlu2 %v245_v6, %s948_s18  ;;  %v898_v6 = vld [vmem:[%s1102_s0 + $0x10] sm:$0xf] }
  0x29   : > { %249 = vrot.lane.b32.xlu0 %v243_v5, %s948_s18  ;;  %v317_v7 = vld.sshfl [vmem:[#allocation1 + $0x10] sm:$0xff pattern:$0x73625140]  ;;  %v313_v8 = vld.sshfl [vmem:[#allocation1] sm:$0xff pattern:$0x73625140] }
  0x2a   : > { %319 = vrot.lane.b32.xlu1 %v313_v8, %s949_s19  ;;  %v315_v9 = vld.sshfl [vmem:[#allocation1 + $0x8] sm:$0xff pattern:$0x73625140]  ;;  %323 = vrot.lane.b32.xlu2 %v317_v7, %s949_s19 }
  0x2b   : > { %384 = vst [vmem:[#allocation1] ss:$4 sm:$0xff] %v991_v0 }
  0x32   : > { %321 = vrot.lane.b32.xlu1 %v315_v9, %s949_s19  ;;  %v387_v10 = vld.sshfl [vmem:[#allocation1 + $0x8] sm:$0xff pattern:$0x73625140]  ;;  %v385_v11 = vld.sshfl [vmem:[#allocation1] sm:$0xff pattern:$0x73625140] }
  0x33   : > { %393 = vrot.lane.b32.xlu0 %v387_v10, %s950_s20  ;;  %v389_v12 = vld.sshfl [vmem:[#allocation1 + $0x10] sm:$0xff pattern:$0x73625140]  ;;  %391 = vrot.lane.b32.xlu2 %v385_v11, %s950_s20 }
  0x34   : > { %456 = vst [vmem:[#allocation1] ss:$4 sm:$0xff] %v991_v0 }
  0x3a   : > { %395 = vrot.lane.b32.xlu1 %v389_v12, %s950_s20 }
  0x3b   : > { %v461_v13 = vld.sshfl [vmem:[#allocation1 + $0x10] sm:$0xff pattern:$0x73625140]  ;;  %v459_v14 = vld.sshfl [vmem:[#allocation1 + $0x8] sm:$0xff pattern:$0x73625140] }
  0x3c   : > { %467 = vrot.lane.b32.xlu0 %v461_v13, %s951_s21  ;;  %v457_v15 = vld.sshfl [vmem:[#allocation1] sm:$0xff pattern:$0x73625140]  ;;  %465 = vrot.lane.b32.xlu2 %v459_v14, %s951_s21 }
  0x3d   : > { %528 = vst [vmem:[#allocation1] ss:$4 sm:$0xff] %v991_v0 }
  0x42   : > { %463 = vrot.lane.b32.xlu1 %v457_v15, %s951_s21  ;;  %s921_s21 = smul.u32 24, %s1107_s13 }
  0x44   : > { %v533_v18 = vld.sshfl [vmem:[#allocation1 + $0x10] sm:$0xff pattern:$0x73625140]  ;;  %v531_v20 = vld.sshfl [vmem:[#allocation1 + $0x8] sm:$0xff pattern:$0x73625140] }
  0x45   : > { %v529_v21 = vld.sshfl [vmem:[#allocation1] sm:$0xff pattern:$0x73625140] }
  0x46   : > { %535 = vrot.lane.b32.xlu0 %v529_v21, %s952_s24  ;;  %600 = vst [vmem:[#allocation1] ss:$4 sm:$0xff] %v991_v0 }
  0x4a   : > { %537 = vrot.lane.b32.xlu1 %v531_v20, %s952_s24 }
  0x4d   : > { %v603_v22 = vld.sshfl [vmem:[#allocation1 + $0x8] sm:$0xff pattern:$0x73625140]  ;;  %v605_v23 = vld.sshfl [vmem:[#allocation1 + $0x10] sm:$0xff pattern:$0x73625140] }
  0x4e   : > { %609 = vrot.lane.b32.xlu0 %v603_v22, %s953_s25  ;;  %v601_v24 = vld.sshfl [vmem:[#allocation1] sm:$0xff pattern:$0x73625140] }
  0x4f   : > { %672 = vst [vmem:[#allocation1] ss:$4 sm:$0xff] %v991_v0  ;;  %607 = vrot.lane.b32.xlu2 %v601_v24, %s953_s25 }
  0x52   : > { %539 = vrot.lane.b32.xlu1 %v533_v18, %s952_s24  ;;  %s170_s24 = scalar_lea.vmem %s1105_s3, %s921_s21 }
  0x56   : > { %v675_v25 = vld.sshfl [vmem:[#allocation1 + $0x8] sm:$0xff pattern:$0x73625140]  ;;  %v673_v26 = vld.sshfl [vmem:[#allocation1] sm:$0xff pattern:$0x73625140] }
  0x57   : > { %681 = vrot.lane.b32.xlu0 %v675_v25, %s954_s26  ;;  %v677_v27 = vld.sshfl [vmem:[#allocation1 + $0x10] sm:$0xff pattern:$0x73625140]  ;;  %611 = vrot.lane.b32.xlu2 %v605_v23, %s953_s25 }
  0x58   : > { %744 = vst [vmem:[#allocation1] ss:$4 sm:$0xff] %v991_v0  ;;  %v902_v23 = vld [vmem:[%s1102_s0 + $0x14] sm:$0xf] }
  0x5a   : > { %683 = vrot.lane.b32.xlu1 %v677_v27, %s954_s26 }
  0x5f   : > { %v749_v28 = vld.sshfl [vmem:[#allocation1 + $0x10] sm:$0xff pattern:$0x73625140]  ;;  %v745_v29 = vld.sshfl [vmem:[#allocation1] sm:$0xff pattern:$0x73625140]  ;;  %679 = vrot.lane.b32.xlu2 %v673_v26, %s954_s26 }
  0x60   : > { %755 = vrot.lane.b32.xlu0 %v749_v28, %s955_s27  ;;  %v747_v30 = vld.sshfl [vmem:[#allocation1 + $0x8] sm:$0xff pattern:$0x73625140] }
  0x62   : > { %751 = vrot.lane.b32.xlu1 %v745_v29, %s955_s27 }
  0x67   : > { %753 = vrot.lane.b32.xlu2 %v747_v30, %s955_s27 }
  0x68   : > { %176 = vperm.xlu0 %939, %v173_v36  }
  0x7c   : > { %v252_v32 = vpop.permute.xlu2 %251 }
  0x7d   : > { %v266_v33 = vsel %vm189_vm0, %v252_v32, 0 }
  0x7e   : > { %301 = vmatpush.bf16.msrb.mxu1 %v266_v33 }
  0x81   : > { %889 = vmatmul.msk.bf16.vlgmr.msrb.gmra.mxu1 %vm185_vm1, %v886_v34 }
  0x84   : > { %v324_v38 = vpop.permute.xlu2 %323 }
  0x85   : > { %v338_v43 = vsel %vm189_vm0, %v324_v38, 0 }
  0x8d   : > { %v392_v46 = vpop.permute.xlu2 %391 }
  0x93   : > { %v248_v37 = vpop.permute.xlu0 %247 }
  0x96   : > { %v466_v57 = vpop.permute.xlu2 %465 }
  0x9b   : > { %v250_v39 = vpop.permute.xlu0 %249 }
  0x9c   : > { %v320_v40 = vpop.permute.xlu1 %319  ;;  %v254_v41 = vsel %vm253_vm2, %v248_v37, %v250_v39  ;;  %v255_v42 = vsel %vm253_vm2, %v250_v39, %v252_v32  ;;  %v910_v39 = vld [vmem:[%s1102_s0 + $0x1c] sm:$0xf] }
  0x9d   : > { %v260_v44 = vsel %vm189_vm0, %v254_v41, 0  ;;  %v263_v45 = vsel %vm189_vm0, %v255_v42, 0  ;;  %v205_v41 = vpop.f32.mrf.mxu0  ;;  %v218_v42 = vpop.f32.mrf.mxu1 }
  0x9e   : > { %275 = vmatpush.bf16.msra.mxu3 %v260_v44  ;;  %288 = vmatpush.bf16.msrb.mxu0 %v263_v45  ;;  %v914_v45 = vld [vmem:[%s1102_s0 + $0x20] sm:$0xf] }
  0xa1   : > { %887 = vmatmul.msk.bf16.vlgmr.msra.gmra.mxu3 %vm185_vm1, %v886_v34  ;;  %888 = vmatmul.msk.bf16.vlgmr.msrb.gmra.mxu0 %vm185_vm1, %v886_v34 }
  0xa2   : > { %373 = vmatpush.bf16.msra.mxu0 %v338_v43 }
  0xa4   : > { %v322_v47 = vpop.permute.xlu1 %321 }
  0xa5   : > { %v326_v48 = vsel %vm325_vm3, %v320_v40, %v322_v47  ;;  %v327_v49 = vsel %vm325_vm3, %v322_v47, %v324_v38  ;;  %v394_v50 = vpop.permute.xlu0 %393  ;;  %v906_v38 = vld [vmem:[%s1102_s0 + $0x18] sm:$0xf]  ;;  %v207_v43 = vpop.f32.mrf.mxu0 }
  0xa6   : > { %v332_v51 = vsel %vm189_vm0, %v326_v48, 0  ;;  %v335_v52 = vsel %vm189_vm0, %v327_v49, 0  ;;  %v398_v53 = vsel %vm397_vm4, %v392_v46, %v394_v50  ;;  %v220_v44 = vpop.f32.mrf.mxu1  ;;  %v231_v46 = vpop.f32.mrf.mxu2 }
  0xa7   : > { %347 = vmatpush.bf16.msrb.mxu2 %v332_v51  ;;  %360 = vmatpush.bf16.msrb.mxu3 %v335_v52  ;;  %v404_v55 = vsel %vm189_vm0, %v398_v53, 0 }
  0xa8   : > { %419 = vmatpush.bf16.msra.mxu1 %v404_v55 }
  0xa9   : > { %v608_v2 = vpop.permute.xlu2 %607 }
  0xaa   : > { %891 = vmatmul.msk.bf16.vlgmr.msrb.gmra.mxu2 %vm185_vm1, %v890_v54 }
  0xab   : > { %895 = vmatmul.msk.bf16.vlgmr.msra.gmra.mxu1 %vm185_vm1, %v894_v56 }
  0xac   : > { %v396_v58 = vpop.permute.xlu1 %395 }
  0xad   : > { %v399_v59 = vsel %vm397_vm4, %v394_v50, %v396_v58  ;;  %v410_v60 = vsel %vm189_vm0, %v396_v58, 0 }
  0xae   : > { %v407_v61 = vsel %vm189_vm0, %v399_v59, 0  ;;  %445 = vmatpush.bf16.msra.mxu3 %v410_v60  ;;  %v468_v62 = vpop.permute.xlu0 %467  ;;  %v233_v47 = vpop.f32.mrf.mxu2 }
  0xaf   : > { %432 = vmatpush.bf16.msra.mxu2 %v407_v61  ;;  %v482_v63 = vsel %vm189_vm0, %v468_v62, 0  ;;  %v471_v0 = vsel %vm469_vm5, %v466_v57, %v468_v62 }
  0xb0   : > { %v479_v1 = vsel %vm189_vm0, %v471_v0, 0 }
  0xb1   : > { %892 = vmatmul.msk.bf16.vlgmr.msrb.gmra.mxu3 %vm185_vm1, %v890_v54  ;;  %893 = vmatmul.msk.bf16.vlgmr.msra.gmra.mxu0 %vm185_vm1, %v890_v54  ;;  %v612_v10 = vpop.permute.xlu2 %611 }
  0xb2   : > { %504 = vmatpush.bf16.msrb.mxu1 %v479_v1  ;;  %v626_v20 = vsel %vm189_vm0, %v612_v10, 0 }
  0xb3   : > { %517 = vmatpush.bf16.msrb.mxu2 %v482_v63 }
  0xb4   : > { %v464_v3 = vpop.permute.xlu1 %463 }
  0xb5   : > { %v470_v4 = vsel %vm469_vm5, %v464_v3, %v466_v57 }
  0xb6   : > { %v476_v5 = vsel %vm189_vm0, %v470_v4, 0 }
  0xb7   : > { %491 = vmatpush.bf16.msrb.mxu0 %v476_v5 }
  0xb8   : > { %v536_v7 = vpop.permute.xlu0 %535 }
  0xb9   : > { %v680_v22 = vpop.permute.xlu2 %679 }
  0xba   : > { %896 = vmatmul.msk.bf16.vlgmr.msra.gmra.mxu2 %vm185_vm1, %v894_v56 }
  0xbb   : > { %900 = vmatmul.msk.bf16.vlgmr.msrb.gmra.mxu1 %vm185_vm1, %v898_v6 }
  0xbc   : > { %v538_v8 = vpop.permute.xlu1 %537 }
  0xbd   : > { %v542_v9 = vsel %vm541_vm6, %v536_v7, %v538_v8 }
  0xbe   : > { %v548_v11 = vsel %vm189_vm0, %v542_v9, 0 }
  0xbf   : > { %563 = vmatpush.bf16.msrb.mxu3 %v548_v11 }
  0xc0   : > { %v610_v12 = vpop.permute.xlu0 %609 }
  0xc1   : > { %897 = vmatmul.msk.bf16.vlgmr.msra.gmra.mxu3 %vm185_vm1, %v894_v56  ;;  %899 = vmatmul.msk.bf16.vlgmr.msrb.gmra.mxu0 %vm185_vm1, %v898_v6  ;;  %v614_v13 = vsel %vm613_vm7, %v608_v2, %v610_v12  ;;  %v615_v14 = vsel %vm613_vm7, %v610_v12, %v612_v10  ;;  %v754_v31 = vpop.permute.xlu2 %753 }
  0xc2   : > { %v620_v15 = vsel %vm189_vm0, %v614_v13, 0  ;;  %v623_v16 = vsel %vm189_vm0, %v615_v14, 0 }
  0xc3   : > { %635 = vmatpush.bf16.msra.mxu2 %v620_v15  ;;  %648 = vmatpush.bf16.msra.mxu3 %v623_v16 }
  0xc4   : > { %v540_v17 = vpop.permute.xlu1 %539 }
  0xc5   : > { %v543_v18 = vsel %vm541_vm6, %v538_v8, %v540_v17  ;;  %v554_v19 = vsel %vm189_vm0, %v540_v17, 0 }
  0xc6   : > { %v551_v21 = vsel %vm189_vm0, %v543_v18, 0  ;;  %589 = vmatpush.bf16.msra.mxu1 %v554_v19 }
  0xc7   : > { %576 = vmatpush.bf16.msra.mxu0 %v551_v21 }
  0xc9   : > { %v682_v24 = vpop.permute.xlu0 %681 }
  0xca   : > { %901 = vmatmul.msk.bf16.vlgmr.msrb.gmra.mxu2 %vm185_vm1, %v898_v6  ;;  %v686_v25 = vsel %vm685_vm8, %v680_v22, %v682_v24 }
  0xcb   : > { %661 = vmatpush.bf16.msrb.mxu0 %v626_v20  ;;  %905 = vmatmul.msk.bf16.vlgmr.msra.gmra.mxu1 %vm185_vm1, %v902_v23  ;;  %v692_v26 = vsel %vm189_vm0, %v686_v25, 0 }
  0xcc   : > { %707 = vmatpush.bf16.msrb.mxu1 %v692_v26  ;;  %v684_v27 = vpop.permute.xlu1 %683 }
  0xcd   : > { %v687_v28 = vsel %vm685_vm8, %v682_v24, %v684_v27  ;;  %v698_v30 = vsel %vm189_vm0, %v684_v27, 0 }
  0xce   : > { %v695_v29 = vsel %vm189_vm0, %v687_v28, 0 }
  0xcf   : > { %720 = vmatpush.bf16.msrb.mxu2 %v695_v29 }
  0xd1   : > { %903 = vmatmul.msk.bf16.vlgmr.msrb.gmra.mxu3 %vm185_vm1, %v902_v23  ;;  %904 = vmatmul.msk.bf16.vlgmr.msra.gmra.mxu0 %vm185_vm1, %v902_v23 }
  0xd2   : > { %733 = vmatpush.bf16.msrb.mxu3 %v698_v30  ;;  %v756_v32 = vpop.permute.xlu0 %755 }
  0xd3   : > { %v759_v33 = vsel %vm757_vm9, %v754_v31, %v756_v32  ;;  %v770_v40 = vsel %vm189_vm0, %v756_v32, 0 }
  0xd4   : > { %v767_v34 = vsel %vm189_vm0, %v759_v33, 0  ;;  %v752_v35 = vpop.permute.xlu1 %751 }
  0xd5   : > { %v758_v36 = vsel %vm757_vm9, %v752_v35, %v754_v31  ;;  %792 = vmatpush.bf16.msra.mxu1 %v767_v34 }
  0xd6   : > { %v764_v37 = vsel %vm189_vm0, %v758_v36, 0 }
  0xd7   : > { %779 = vmatpush.bf16.msra.mxu0 %v764_v37 }
  0xda   : > { %907 = vmatmul.msk.bf16.vlgmr.msra.gmra.mxu2 %vm185_vm1, %v906_v38  ;;  %v177_v48 = vpop.permute.xlu0 %176 }
  0xdb   : > { %911 = vmatmul.msk.bf16.vlgmr.msrb.gmra.mxu1 %vm185_vm1, %v910_v39  ;;  %805 = vmatpush.bf16.msra.mxu2 %v770_v40  ;;  %v237_v49 = vadd.f32 %v231_v46, %v177_v48  ;;  %v236_v53 = vadd.f32 %v218_v42, %v177_v48  ;;  %v235_v20 = vadd.f32 %v205_v41, %v177_v48 }
  0xe1   : > { %908 = vmatmul.msk.bf16.vlgmr.msra.gmra.mxu3 %vm185_vm1, %v906_v38  ;;  %909 = vmatmul.msk.bf16.vlgmr.msrb.gmra.mxu0 %vm185_vm1, %v906_v38 }
  0xea   : > { %912 = vmatmul.msk.bf16.vlgmr.msrb.gmra.mxu2 %vm185_vm1, %v910_v39 }
  0xeb   : > { %916 = vmatmul.msk.bf16.vlgmr.msra.gmra.mxu1 %vm185_vm1, %v914_v45 }
  0xf1   : > { %913 = vmatmul.msk.bf16.vlgmr.msrb.gmra.mxu3 %vm185_vm1, %v910_v39  ;;  %915 = vmatmul.msk.bf16.vlgmr.msra.gmra.mxu0 %vm185_vm1, %v914_v45 }
  0xfa   : > { %917 = vmatmul.msk.bf16.vlgmr.msra.gmra.mxu2 %vm185_vm1, %v914_v45 }
  0xfe   : > { %v303_v50 = vpop.f32.mrf.mxu1 }
  0xff   : > { %v309_v51 = vadd.f32 %v303_v50, %v237_v49 }
 0x106   : > { %v305_v52 = vpop.f32.mrf.mxu1 }
 0x11e   : > { %v290_v54 = vpop.f32.mrf.mxu0 }
 0x11f   : > { %v308_v55 = vadd.f32 %v290_v54, %v236_v53 }
 0x124   : > { %v277_v56 = vpop.f32.mrf.mxu3 }
 0x125   : > { %v307_v22 = vadd.f32 %v277_v56, %v235_v20 }
 0x126   : > { %v292_v57 = vpop.f32.mrf.mxu0 }
 0x128   : > { %v421_v58 = vpop.f32.mrf.mxu1 }
 0x12c   : > { %v279_v59 = vpop.f32.mrf.mxu3 }
 0x12d   : > { %v349_v60 = vpop.f32.mrf.mxu2 }
 0x12e   : > { %v375_v61 = vpop.f32.mrf.mxu0  ;;  %v379_v25 = vadd.f32 %v349_v60, %v307_v22 }
 0x12f   : > { %v381_v62 = vadd.f32 %v375_v61, %v309_v51 }
 0x130   : > { %v423_v63 = vpop.f32.mrf.mxu1  ;;  %v451_v28 = vadd.f32 %v421_v58, %v379_v25 }
 0x134   : > { %v362_v0 = vpop.f32.mrf.mxu3 }
 0x135   : > { %v351_v1 = vpop.f32.mrf.mxu2  ;;  %v380_v27 = vadd.f32 %v362_v0, %v308_v55 }
 0x136   : > { %v377_v2 = vpop.f32.mrf.mxu0 }
 0x138   : > { %v506_v3 = vpop.f32.mrf.mxu1 }
 0x13c   : > { %v364_v4 = vpop.f32.mrf.mxu3 }
 0x13d   : > { %v434_v5 = vpop.f32.mrf.mxu2 }
 0x13e   : > { %v493_v6 = vpop.f32.mrf.mxu0  ;;  %v452_v29 = vadd.f32 %v434_v5, %v380_v27 }
 0x13f   : > { %v523_v31 = vadd.f32 %v493_v6, %v451_v28 }
 0x140   : > { %v508_v7 = vpop.f32.mrf.mxu1  ;;  %v524_v35 = vadd.f32 %v506_v3, %v452_v29 }
 0x144   : > { %v447_v8 = vpop.f32.mrf.mxu3 }
 0x145   : > { %v436_v9 = vpop.f32.mrf.mxu2  ;;  %v453_v49 = vadd.f32 %v447_v8, %v381_v62 }
 0x146   : > { %v495_v10 = vpop.f32.mrf.mxu0 }
 0x148   : > { %v591_v11 = vpop.f32.mrf.mxu1 }
 0x14c   : > { %v449_v12 = vpop.f32.mrf.mxu3 }
 0x14d   : > { %v519_v13 = vpop.f32.mrf.mxu2 }
 0x14e   : > { %v578_v14 = vpop.f32.mrf.mxu0  ;;  %v525_v51 = vadd.f32 %v519_v13, %v453_v49 }
 0x14f   : > { %v596_v38 = vadd.f32 %v578_v14, %v524_v35 }
 0x150   : > { %v593_v15 = vpop.f32.mrf.mxu1  ;;  %v597_v55 = vadd.f32 %v591_v11, %v525_v51 }
 0x154   : > { %v565_v16 = vpop.f32.mrf.mxu3 }
 0x155   : > { %v521_v17 = vpop.f32.mrf.mxu2  ;;  %v595_v34 = vadd.f32 %v565_v16, %v523_v31 }
 0x156   : > { %v580_v18 = vpop.f32.mrf.mxu0 }
 0x158   : > { %v709_v19 = vpop.f32.mrf.mxu1 }
 0x15c   : > { %v567_v21 = vpop.f32.mrf.mxu3 }
 0x15d   : > { %v637_v23 = vpop.f32.mrf.mxu2 }
 0x15e   : > { %v663_v24 = vpop.f32.mrf.mxu0  ;;  %v667_v37 = vadd.f32 %v637_v23, %v595_v34 }
 0x15f   : > { %v669_v56 = vadd.f32 %v663_v24, %v597_v55 }
 0x160   : > { %v711_v26 = vpop.f32.mrf.mxu1  ;;  %v739_v41 = vadd.f32 %v709_v19, %v667_v37 }
 0x164   : > { %v650_v30 = vpop.f32.mrf.mxu3 }
 0x165   : > { %v639_v32 = vpop.f32.mrf.mxu2  ;;  %v668_v39 = vadd.f32 %v650_v30, %v596_v38 }
 0x166   : > { %v665_v33 = vpop.f32.mrf.mxu0 }
 0x168   : > { %v794_v36 = vpop.f32.mrf.mxu1 }
 0x16c   : > { %v652_v40 = vpop.f32.mrf.mxu3 }
 0x16d   : > { %v722_v42 = vpop.f32.mrf.mxu2 }
 0x16e   : > { %v740_v43 = vadd.f32 %v722_v42, %v668_v39  ;;  %v781_v44 = vpop.f32.mrf.mxu0 }
 0x16f   : > { %v811_v45 = vadd.f32 %v781_v44, %v739_v41 }
 0x170   : > { %v812_v46 = vadd.f32 %v794_v36, %v740_v43  ;;  %v796_v47 = vpop.f32.mrf.mxu1 }
 0x171   : > { %v814_v48 = vmax.f32 %v811_v45, 0.0 }
 0x172   : > { %v815_v50 = vmax.f32 %v812_v46, 0.0 }
 0x173   : > { %817 = vst [vmem:[%s170_s24] sm:$0xff] %v814_v48 }
 0x174   : > { %818 = vst [vmem:[%s170_s24 + $0x8] sm:$0xff] %v815_v50  ;;  %v735_v52 = vpop.f32.mrf.mxu3 }
 0x175   : > { %v724_v53 = vpop.f32.mrf.mxu2  ;;  %v741_v57 = vadd.f32 %v735_v52, %v669_v56 }
 0x176   : > { %v783_v54 = vpop.f32.mrf.mxu0 }
 0x17c   : > { %v737_v58 = vpop.f32.mrf.mxu3 }
 0x17d   : > { %v807_v59 = vpop.f32.mrf.mxu2 }
 0x17e   : > { %v813_v60 = vadd.f32 %v807_v59, %v741_v57 }
 0x180   : > { %v816_v61 = vmax.f32 %v813_v60, 0.0 }
 0x182   : > { %820 = vst.msk [vmem:[%s170_s24 + $0x10] sm:$0xff] %vm819_vm10, %v816_v61 }
 0x185   : > { %v809_v63 = vpop.f32.mrf.mxu2 }
 0x186 PF: > { %s13_s12 = sadd.s32 1, %s946_s12  }
 0x187   : > { %p10_p4 = scmp.ge.s32.totalorder %s13_s12, 4  }
 0x189   :  { %12 = sbr.rel (!%p10_p4) target bundleno = 1 (0x1), region = 70 }

</bundles_post_ra>
